<compile_context>
chip_gen: v7x
topology: tpu7x:2x2x1
jax: 0.10.0
libtpu: 0.0.40
codegen_flags: <defaults>
</compile_context>

<pallas_src>
import functools
import math

import jax
import jax.numpy as jnp
from jax.experimental import pallas as pl
from jax.experimental.pallas import tpu as pltpu


def _round_up(x, m):
    return ((x + m - 1) // m) * m


@functools.lru_cache(maxsize=1)
def _vmem_capacity_bytes():
    try:
        return int(pltpu.get_tpu_info().vmem_capacity_bytes)
    except Exception:
        return 64 << 20  # conservative default (v7x per-TensorCore VMEM)


def _pick_tk(d_ff_p, target):
    """Largest multiple of 128 that divides d_ff_p (itself a mult of 128) and is <= target."""
    m = d_ff_p // 128
    cap = max(1, min(target, d_ff_p) // 128)
    for cand in range(cap, 0, -1):
        if m % cand == 0:
            return 128 * cand
    return 128


def _vmem_estimate(tm, tk, d_model, d_ff_p, nk, x_it, w_it, extra_w_buf=False):
    """Rough VMEM footprint of one grid step (double-buffered I/O + temporaries)."""
    w_bufs = 3 if extra_w_buf else 2
    b = 0
    b += 2 * tm * d_model * x_it          # x tile (double buffered)
    b += w_bufs * d_model * tk * w_it     # W1 chunk
    b += w_bufs * tk * d_model * w_it     # W2 chunk
    b += 2 * d_ff_p * w_it                # b1 (resident, counted conservatively)
    b += 2 * d_model * w_it               # b2
    b += 2 * tm * d_model * x_it          # output tile
    if nk > 1:
        b += tm * d_model * 4             # f32 accumulator scratch
    b += tm * tk * (4 + w_it)             # h intermediate (f32) + cast copy
    b += tm * d_model * 4                 # f32 result of the 2nd dot
    return b


def ffn_kernel(x_ref, w1_ref, b1_ref, w2_ref, b2_ref, o_ref, *scratch, tk, nk):
    # x_ref : (TM, d_model)   w1_ref: (d_model, TK)   b1_ref: (1, d_ff_p) resident
    # w2_ref: (TK, d_model)   b2_ref: (1, d_model)    o_ref : (TM, d_model)
    # scratch: (acc_ref,) f32 only when nk > 1
    k = pl.program_id(1)
    x = x_ref[...]

    # b1 stays resident as one (1, d_ff) block; slice the chunk for this k step.
    if nk == 1:
        b1 = b1_ref[...]
    else:
        start = pl.multiple_of(k * tk, 128)
        b1 = b1_ref[:, pl.ds(start, tk)]

    # first matmul + bias + ReLU (f32 accumulation on the MXU)
    h = jnp.dot(x, w1_ref[...], preferred_element_type=jnp.float32)
    h = jnp.maximum(h + b1.astype(jnp.float32), 0.0)
    # dropout (eval mode) == identity
    h = h.astype(w2_ref.dtype)
    y = jnp.dot(h, w2_ref[...], preferred_element_type=jnp.float32)

    if nk == 1:
        # resident-weights / single-chunk path: no accumulator round-trip
        o_ref[...] = (y + b2_ref[...].astype(jnp.float32)).astype(o_ref.dtype)
    else:
        acc_ref = scratch[0]

        @pl.when(k == 0)
        def _init():
            acc_ref[...] = jnp.zeros_like(acc_ref)

        acc_ref[...] += y

        @pl.when(k == nk - 1)
        def _finalize():
            o_ref[...] = (acc_ref[...] + b2_ref[...].astype(jnp.float32)).astype(o_ref.dtype)


@functools.partial(
    jax.jit,
    static_argnames=("tm", "tk", "d_ff_p", "nk", "vmem_limit", "extra_w_buf"),
)
def _ffn_pallas(x2d, w1, b1, w2, b2, *, tm, tk, d_ff_p, nk, vmem_limit, extra_w_buf):
    rows, d_model = x2d.shape
    d_ff = w1.shape[1]

    rows_p = _round_up(rows, tm)
    if rows_p != rows:
        x2d = jnp.pad(x2d, ((0, rows_p - rows), (0, 0)))
    if d_ff_p != d_ff:
        # Zero-padding d_ff is exact: padded h columns are relu(0+0)=0 and the
        # padded W2 rows are zero, contributing nothing to the output.
        w1 = jnp.pad(w1, ((0, 0), (0, d_ff_p - d_ff)))
        b1 = jnp.pad(b1, ((0, d_ff_p - d_ff),))
        w2 = jnp.pad(w2, ((0, d_ff_p - d_ff), (0, 0)))

    b1_2d = b1.reshape(1, d_ff_p)
    b2_2d = b2.reshape(1, d_model)

    grid = (rows_p // tm, nk)
    n_row_tiles = grid[0]
    weight_passes = 1 if nk == 1 else max(1, n_row_tiles)

    isz = lambda shape, dt: math.prod(shape) * jnp.dtype(dt).itemsize
    cost = pl.CostEstimate(
        flops=2 * 2 * rows * d_model * d_ff,
        transcendentals=0,
        bytes_accessed=(
            isz((rows, d_model), x2d.dtype)
            + weight_passes * (isz((d_model, d_ff_p), w1.dtype)
                               + isz((d_ff_p, d_model), w2.dtype))
            + isz((d_ff_p,), b1.dtype)
            + isz((d_model,), b2.dtype)
            + isz((rows, d_model), x2d.dtype)
        ),
    )

    def _w_spec(shape, index_map):
        # Deeper buffering on the dominant (weight) DMA stream when requested.
        if extra_w_buf:
            try:
                return pl.BlockSpec(shape, index_map, pipeline_mode=pl.Buffered(3))
            except (TypeError, AttributeError):
                pass
        return pl.BlockSpec(shape, index_map)

    kernel = functools.partial(ffn_kernel, tk=tk, nk=nk)
    scratch = [] if nk == 1 else [pltpu.VMEM((tm, d_model), jnp.float32)]

    out2d = pl.pallas_call(
        kernel,
        out_shape=jax.ShapeDtypeStruct((rows_p, d_model), x2d.dtype),
        grid_spec=pltpu.PrefetchScalarGridSpec(
            num_scalar_prefetch=0,
            grid=grid,
            in_specs=[
                pl.BlockSpec((tm, d_model), lambda i, k: (i, 0)),   # x tile
                _w_spec((d_model, tk), lambda i, k: (0, k)),        # W1 chunk
                pl.BlockSpec((1, d_ff_p), lambda i, k: (0, 0)),     # b1 (resident)
                _w_spec((tk, d_model), lambda i, k: (k, 0)),        # W2 chunk
                pl.BlockSpec((1, d_model), lambda i, k: (0, 0)),    # b2
            ],
            out_specs=pl.BlockSpec((tm, d_model), lambda i, k: (i, 0)),
            scratch_shapes=scratch,
        ),
        compiler_params=pltpu.CompilerParams(
            dimension_semantics=("parallel", "arbitrary"),
            vmem_limit_bytes=int(vmem_limit),
        ),
        cost_estimate=cost,
    )(x2d, w1, b1_2d, w2, b2_2d)

    return out2d[:rows]


def feed_forward_block(x, w1, b1, w2, b2, *, tile_rows=None, tile_ff=None,
                       allow_resident=True):
    """y = relu(x @ W1 + b1) @ W2 + b2  (dropout in eval mode = identity).

    x : (B, S, d_model)
    w1: (d_model, d_ff)  [pre-transposed from torch's (d_ff, d_model)]
    b1: (d_ff,),  w2: (d_ff, d_model),  b2: (d_model,)
    """
    B, S, d_model = x.shape
    d_ff = w1.shape[1]
    rows = B * S

    x_it = jnp.dtype(x.dtype).itemsize
    w_it = jnp.dtype(w1.dtype).itemsize

    vmem_cap = _vmem_capacity_bytes()
    big_vmem = vmem_cap >= (100 << 20)   # v5e/v6e (128 MiB) vs v7x (64 MiB)
    budget = int(0.75 * vmem_cap)

    # Sub-32-bit dtypes pack rows along sublanes; keep the row tile aligned to
    # the packed sublane count (8 f32 / 16 bf16 / 32 int8-fp8).
    row_align = {1: 32, 2: 16}.get(x_it, 8)

    if tile_rows is None:
        tile_rows = 1024 if big_vmem else 512
    if tile_ff is None:
        tile_ff = 1024 if big_vmem else 256

    d_ff_p = _round_up(d_ff, 128)
    tm = max(row_align,
             min(_round_up(tile_rows, row_align), _round_up(rows, row_align)))

    # --- resident-weights regime: keep W1/W2 on-chip across all row tiles ----
    resident = allow_resident and (
        _vmem_estimate(tm, d_ff_p, d_model, d_ff_p, 1, x_it, w_it) <= budget)
    if allow_resident and not resident:
        # Retry with a moderate row tile before giving up on residency.
        tm_small = max(row_align, min(tm, _round_up(256, row_align)))
        if _vmem_estimate(tm_small, d_ff_p, d_model, d_ff_p, 1, x_it, w_it) <= budget:
            resident, tm = True, tm_small

    if resident:
        tk, nk = d_ff_p, 1
    else:
        # --- streaming regime: tile d_ff so W1/W2 chunks stay small ----------
        tk = _pick_tk(d_ff_p, tile_ff)
        if tk * 2 <= tile_ff and d_ff_p > tile_ff:
            # Awkward d_ff (e.g. 13696): pad up to a multiple of tile_ff rather
            # than living with a tiny tk (<= tile_ff/d_ff extra weight traffic).
            d_ff_p = _round_up(d_ff_p, tile_ff)
            tk = tile_ff
        nk = d_ff_p // tk
        # Shrink tiles until the footprint fits this chip's VMEM.
        while (_vmem_estimate(tm, tk, d_model, d_ff_p, nk, x_it, w_it) > budget
               and tm > row_align):
            tm = max(row_align, _round_up(tm // 2, row_align))
        while (_vmem_estimate(tm, tk, d_model, d_ff_p, nk, x_it, w_it) > budget
               and tk > 128):
            tk = _pick_tk(d_ff_p, tk // 2)
            nk = d_ff_p // tk

    # Keep >= 2 row tiles when it is free: always fine with resident weights,
    # and needed on 2-TensorCore chips (v7x, 64 MiB VMEM proxy) so the second
    # core gets work.  Avoided in the streaming regime on 1-TC chips since
    # extra row tiles re-stream the weights.
    if rows >= 2 * row_align and (resident or not big_vmem):
        tm = min(tm, max(row_align, _round_up(-(-rows // 2), row_align)))

    # Optional 3-deep buffering on the weight streams (streaming regime, big
    # VMEM, enough k steps, headroom available).
    extra_w_buf = (
        (not resident) and big_vmem and nk >= 3
        and _vmem_estimate(tm, tk, d_model, d_ff_p, nk, x_it, w_it,
                           extra_w_buf=True) <= budget
    )

    est = _vmem_estimate(tm, tk, d_model, d_ff_p, nk, x_it, w_it,
                         extra_w_buf=extra_w_buf)
    vmem_limit = int(min(max(est + (8 << 20), 32 << 20), int(0.95 * vmem_cap)))
    vmem_limit = max(vmem_limit, est + (2 << 20))

    x2d = x.reshape(rows, d_model)
    out2d = _ffn_pallas(
        x2d, w1, b1, w2, b2,
        tm=int(tm), tk=int(tk), d_ff_p=int(d_ff_p), nk=int(nk),
        vmem_limit=int(vmem_limit), extra_w_buf=bool(extra_w_buf),
    )
    return out2d.reshape(B, S, d_model)


def init_params(key, d_model, d_ff, dtype=jnp.float32):
    """Deterministic init mimicking nn.Linear (uniform +-1/sqrt(fan_in)).
    Weights are stored pre-transposed as (in_features, out_features)."""
    k1, k2, k3, k4 = jax.random.split(key, 4)
    lim1 = 1.0 / (d_model ** 0.5)
    lim2 = 1.0 / (d_ff ** 0.5)
    w1 = jax.random.uniform(k1, (d_model, d_ff), jnp.float32, -lim1, lim1).astype(dtype)
    b1 = jax.random.uniform(k2, (d_ff,), jnp.float32, -lim1, lim1).astype(dtype)
    w2 = jax.random.uniform(k3, (d_ff, d_model), jnp.float32, -lim2, lim2).astype(dtype)
    b2 = jax.random.uniform(k4, (d_model,), jnp.float32, -lim2, lim2).astype(dtype)
    return w1, b1, w2, b2


def _ref(x, w1, b1, w2, b2):
    xf = x.astype(jnp.float32)
    h = jnp.maximum(xf @ w1.astype(jnp.float32) + b1.astype(jnp.float32), 0.0)
    return h @ w2.astype(jnp.float32) + b2.astype(jnp.float32)


if __name__ == "__main__":
    key = jax.random.PRNGKey(0)
    k1, k2, k3, k4, k5, k6 = jax.random.split(key, 6)

    # --- check 1: small f32, resident-weight path, d_ff padded 64 -> 128 ----
    B, S, d_model, d_ff = 2, 8, 32, 64
    x = jax.random.normal(k1, (B, S, d_model), jnp.float32)
    w1, b1, w2, b2 = init_params(k2, d_model, d_ff, jnp.float32)
    out = jax.block_until_ready(feed_forward_block(x, w1, b1, w2, b2))
    ref = _ref(x, w1, b1, w2, b2)
    assert out.shape == (B, S, d_model)
    assert jnp.allclose(out, ref, atol=1e-4, rtol=1e-4), "check1: f32 mismatch"

    # --- check 2: bf16, ragged rows, forced streaming (2 d_ff chunks) -------
    B2, S2, dm2, dff2 = 3, 5, 128, 256
    x2 = jax.random.normal(k3, (B2, S2, dm2), jnp.float32).astype(jnp.bfloat16)
    w1b, b1b, w2b, b2b = init_params(k4, dm2, dff2, jnp.bfloat16)
    out2 = jax.block_until_ready(
        feed_forward_block(x2, w1b, b1b, w2b, b2b, tile_ff=128, allow_resident=False)
    )
    ref2 = _ref(x2, w1b, b1b, w2b, b2b)
    assert out2.shape == (B2, S2, dm2)
    assert jnp.allclose(out2.astype(jnp.float32), ref2, atol=5e-2, rtol=5e-2), \
        "check2: bf16 mismatch"

    # --- check 3: multiple row tiles + multi-chunk reduction, f32 -----------
    B3, S3, dm3, dff3 = 2, 20, 64, 256
    x3 = jax.random.normal(k5, (B3, S3, dm3), jnp.float32)
    w1c, b1c, w2c, b2c = init_params(k6, dm3, dff3, jnp.float32)
    out3 = jax.block_until_ready(
        feed_forward_block(x3, w1c, b1c, w2c, b2c,
                           tile_rows=16, tile_ff=128, allow_resident=False)
    )
    ref3 = _ref(x3, w1c, b1c, w2c, b2c)
    assert out3.shape == (B3, S3, dm3)
    assert jnp.allclose(out3, ref3, atol=1e-4, rtol=1e-4), "check3: f32 tiled mismatch"

    print("KERNEL_OK")
</pallas_src>

<mosaic_0001>
module attributes {stable_mosaic.version = 11 : i64} {
  func.func @ffn_kernel(%arg0: i32, %arg1: i32, %arg2: memref<8x32xf32, #tpu.memory_space<vmem>>, %arg3: memref<32x128xf32, #tpu.memory_space<vmem>>, %arg4: memref<1x128xf32, #tpu.memory_space<vmem>>, %arg5: memref<128x32xf32, #tpu.memory_space<vmem>>, %arg6: memref<1x32xf32, #tpu.memory_space<vmem>>, %arg7: memref<8x32xf32, #tpu.memory_space<vmem>>) attributes {dimension_semantics = [#tpu.dimension_semantics<parallel>, #tpu.dimension_semantics<arbitrary>], iteration_bounds = array<i64: 2, 1>, scalar_prefetch = 0 : i64, scratch_operands = 0 : i64, tpu.core_type = #tpu.core_type<tc>, window_params = [{transform_indices = @transform_0, window_bounds = array<i64: 8, 32>}, {transform_indices = @transform_1, window_bounds = array<i64: 32, 128>}, {pipeline_mode = #tpu.pipeline_mode<synchronous>, transform_indices = @transform_2, window_bounds = array<i64: 1, 128>}, {transform_indices = @transform_3, window_bounds = array<i64: 128, 32>}, {pipeline_mode = #tpu.pipeline_mode<synchronous>, transform_indices = @transform_4, window_bounds = array<i64: 1, 32>}, {transform_indices = @transform_5, window_bounds = array<i64: 8, 32>}]} {
    %c0 = arith.constant 0 : index
    %c0_0 = arith.constant 0 : index
    %0 = vector.load %arg2[%c0, %c0_0] : memref<8x32xf32, #tpu.memory_space<vmem>>, vector<8x32xf32>
    %c0_1 = arith.constant 0 : index
    %c0_2 = arith.constant 0 : index
    %1 = vector.load %arg4[%c0_1, %c0_2] : memref<1x128xf32, #tpu.memory_space<vmem>>, vector<1x128xf32>
    %c0_3 = arith.constant 0 : index
    %c0_4 = arith.constant 0 : index
    %2 = vector.load %arg3[%c0_3, %c0_4] : memref<32x128xf32, #tpu.memory_space<vmem>>, vector<32x128xf32>
    %cst = arith.constant dense<0.000000e+00> : vector<8x128xf32>
    %3 = tpu.matmul %0, %2, %cst {dimension_numbers = #tpu.dot_dimension_numbers<[1], [0], [0], [1], [0, 0, 1, 1], [], []>} : vector<8x32xf32>, vector<32x128xf32>, vector<8x128xf32> -> vector<8x128xf32>
    %4 = vector.broadcast %1 : vector<1x128xf32> to vector<8x128xf32>
    %5 = arith.addf %3, %4 : vector<8x128xf32>
    %cst_5 = arith.constant 0.000000e+00 : f32
    %6 = vector.broadcast %cst_5 : f32 to vector<8x128xf32>
    %7 = arith.maximumf %5, %6 : vector<8x128xf32>
    %c0_6 = arith.constant 0 : index
    %c0_7 = arith.constant 0 : index
    %8 = vector.load %arg5[%c0_6, %c0_7] : memref<128x32xf32, #tpu.memory_space<vmem>>, vector<128x32xf32>
    %cst_8 = arith.constant dense<0.000000e+00> : vector<8x32xf32>
    %9 = tpu.matmul %7, %8, %cst_8 {dimension_numbers = #tpu.dot_dimension_numbers<[1], [0], [0], [1], [0, 0, 1, 1], [], []>} : vector<8x128xf32>, vector<128x32xf32>, vector<8x32xf32> -> vector<8x32xf32>
    %c0_9 = arith.constant 0 : index
    %c0_10 = arith.constant 0 : index
    %10 = vector.load %arg6[%c0_9, %c0_10] : memref<1x32xf32, #tpu.memory_space<vmem>>, vector<1x32xf32>
    %11 = vector.broadcast %10 : vector<1x32xf32> to vector<8x32xf32>
    %12 = arith.addf %9, %11 : vector<8x32xf32>
    %c0_11 = arith.constant 0 : index
    %c0_12 = arith.constant 0 : index
    %13 = vector.load %arg7[%c0_11, %c0_12] : memref<8x32xf32, #tpu.memory_space<vmem>>, vector<8x32xf32>
    tpu.vector_store %arg7[%c0_11, %c0_12], %12 {strides = array<i32>} : memref<8x32xf32, #tpu.memory_space<vmem>>, vector<8x32xf32>,
    return
  }
  func.func @transform_0(%arg0: i32, %arg1: i32) -> (i32, i32) {
    %c0_i32 = arith.constant 0 : i32
    %c0_i32_0 = arith.constant 0 : i32
    return %arg0, %c0_i32 : i32, i32
  }
  func.func @transform_1(%arg0: i32, %arg1: i32) -> (i32, i32) {
    %c0_i32 = arith.constant 0 : i32
    %c0_i32_0 = arith.constant 0 : i32
    return %c0_i32, %arg1 : i32, i32
  }
  func.func @transform_2(%arg0: i32, %arg1: i32) -> (i32, i32) {
    %c0_i32 = arith.constant 0 : i32
    %c0_i32_0 = arith.constant 0 : i32
    %c0_i32_1 = arith.constant 0 : i32
    return %c0_i32, %c0_i32_0 : i32, i32
  }
  func.func @transform_3(%arg0: i32, %arg1: i32) -> (i32, i32) {
    %c0_i32 = arith.constant 0 : i32
    %c0_i32_0 = arith.constant 0 : i32
    return %arg1, %c0_i32 : i32, i32
  }
  func.func @transform_4(%arg0: i32, %arg1: i32) -> (i32, i32) {
    %c0_i32 = arith.constant 0 : i32
    %c0_i32_0 = arith.constant 0 : i32
    %c0_i32_1 = arith.constant 0 : i32
    return %c0_i32, %c0_i32_0 : i32, i32
  }
  func.func @transform_5(%arg0: i32, %arg1: i32) -> (i32, i32) {
    %c0_i32 = arith.constant 0 : i32
    %c0_i32_0 = arith.constant 0 : i32
    return %arg0, %c0_i32 : i32, i32
  }
}

</mosaic_0001>

<bundles_post_ra>
// kernel: _ffn_pallas.1
= control target key start
LH: loop header
LB: loop body
LE: loop exit
PB: predicated region body
PF: predicated region fallthrough
CT: control target
= control target key end

     0   :  { %10 = vsyncpa [#allocation3], 0  ;;  %s1029_s0 = inlined_call_operand.vmem [shape: f32[16,32], index: 0, kind: input, shape index: {}]   ;;  %s1030_s1 = inlined_call_operand.vmem [shape: f32[32,128], index: 1, kind: input, shape index: {}]   ;;  %s1031_s2 = inlined_call_operand.vmem [shape: f32[1,128], index: 2, kind: input, shape index: {}]   ;;  %s1032_s3 = inlined_call_operand.vmem [shape: f32[128,32], index: 3, kind: input, shape index: {}]   ;;  %s1033_s4 = inlined_call_operand.vmem [shape: f32[1,32], index: 4, kind: input, shape index: {}]   ;;  %s1034_s5 = inlined_call_operand.hbm [shape: f32[16,32], index: 5, kind: output, shape index: {}]  }
   0x1   :  { %12 = vsyncpa [#allocation3 + $0x1], 0  ;;  %s849_s18 = smov 0   ;;  %s851_s19 = smov 0  }
   0x2   :  { %s853_s20 = smov 0   ;;  %s855_s21 = smov 0  }
   0x3   :  { %s857_s22 = smov 0   ;;  %s859_s23 = smov 0  }
   0x4 LB: > { %s563_s24 = sadd.s32 4294967295, %s813_s23   ;;  %s564_s25 = sadd.s32 4294967294, %s813_s23   ;;  %s813_s23 = sphi %s859_s23, %s18_s23   ;;  %s809_s22 = sphi %s857_s22, %s1041_s22   ;;  %s805_s21 = sphi %s855_s21, %s1040_s21   ;;  %s801_s20 = sphi %s853_s20, %s1039_s20   ;;  %s797_s19 = sphi %s851_s19, %s1038_s19   ;;  %s793_s18 = sphi %s849_s18, %s1037_s18  }
   0x5   : > { %s30_s26 = sadd.s32 1, %s809_s22  ;;  %s157_s27 = sadd.s32 1, %s801_s20 }
   0x6   : > { %p32_p0 = scmp.ge.s32.totalorder %s30_s26, 2  ;;  %p167_p1 = scmp.ne.s32.totalorder %s801_s20, %s797_s19 }
   0x7   : > { %p168_p2 = scmp.eq.s32.totalorder %s563_s24, 1  ;;  %p173_p3 = scmp.ne.s32.totalorder %s797_s19, %s793_s18 }
   0x8   : > { %s1043_s26 = smov (%p32_p0, %s30_s26), 0  ;;  %p174_p5 = scmp.eq.s32.totalorder %s564_s25, 1 }
   0x9   : > { %p889_p4 = por %p168_p2, %p167_p1  ;;  %s154_s29 = ssub.s32 %s809_s22, %s1043_s26 }
   0xa   : > { %p569_p6 = scmp.ge.s32.totalorder %s813_s23, 1  ;;  %p155_p7 = scmp.eq.s32.totalorder %s154_s29, 0 }
   0xb   : > { %p896_p8 = por %p174_p5, %p173_p3  ;;  %p221_p9 = scmp.lt.s32.totalorder %s813_s23, 3 }
   0xc   : > { %s902_s6 = scalar_select %p155_p7, %s801_s20, %s157_s27  }
   0xd   : > { %p222_p10 = pnand %p569_p6, %p221_p9 }
   0xe   : > { %v273_v0 = vld [vmem:[%s1030_s1] sm:$0xff] (!%p222_p10)  ;;  %v274_v1 = vld [vmem:[%s1030_s1 + $0x8] sm:$0xff] (!%p222_p10)  ;;  %v275_v2 = vld [vmem:[%s1030_s1 + $0x10] sm:$0xff] (!%p222_p10)  ;;  %v815_v3 = vmov (!%p222_p10), 0.0|0.0   ;;  %vm816_vm0 = vmmov (!%p222_p10), 0   ;;  %v817_v6 = vmov (!%p222_p10), 0.0  }
   0xf   : > { %225 = sbr.rel (%p222_p10) target bundleno = 471 (0x1d7), region = 40  ;;  %647 = vmatprep.subr.bf16.mxu0 (!%p222_p10), %v815_v3  ;;  %v648_v4 = vpack.c.bf16 (!%p222_p10), %v274_v1, %v273_v0  ;;  %v276_v5 = vld [vmem:[%s1030_s1 + $0x18] sm:$0xff] (!%p222_p10)  ;;  %609 = vmatprep.mubr.msk.f32.mxu0 (!%p222_p10), %vm816_vm0, %v817_v6  ;;  %p257_p11 = scmp.lt.s32.totalorder (!%p222_p10), %s805_s21, 1  ;;  %v358_v7 = vld [vmem:[%s1032_s3] sm:$0xff] (!%p222_p10)  ;;  %v359_v8 = vld [vmem:[%s1032_s3 + $0x8] sm:$0xff] (!%p222_p10)  ;;  %vm283_vm1 = vcmask (!%p222_p10), 261120  }
  0x10   : > { %653 = vmatprep.subr.bf16.mxu1 (!%p222_p10), %v815_v3  ;;  %v654_v9 = vpack.c.bf16 (!%p222_p10), %v359_v8, %v358_v7  ;;  %v360_v10 = vld [vmem:[%s1032_s3 + $0x10] sm:$0xff] (!%p222_p10)  ;;  %v361_v11 = vld [vmem:[%s1032_s3 + $0x18] sm:$0xff] (!%p222_p10)  ;;  %644 = vmatprep.mubr.msk.f32.mxu1 (!%p222_p10), %vm816_vm0, %v817_v6  ;;  %v651_v12 = vpack.c.bf16 (!%p222_p10), %v276_v5, %v275_v2  ;;  %v362_v14 = vld [vmem:[%s1032_s3 + $0x20] sm:$0xff] (!%p222_p10)  ;;  %s576_s13 = sshll.u32 (!%p222_p10), %s805_s21, 7 }
  0x11   : > { %649 = vmatpush3.bf16.msra.mxu0 (!%p222_p10), %v648_v4  ;;  %v657_v13 = vpack.c.bf16 (!%p222_p10), %v361_v11, %v360_v10  ;;  %v363_v15 = vld [vmem:[%s1032_s3 + $0x28] sm:$0xff] (!%p222_p10)  ;;  %v364_v18 = vld [vmem:[%s1032_s3 + $0x30] sm:$0xff] (!%p222_p10)  ;;  %v365_v19 = vld [vmem:[%s1032_s3 + $0x38] sm:$0xff] (!%p222_p10)  ;;  %s981_s24 = scalar_lea.hbm (!%p222_p10), %s1034_s5, %s576_s13 }
  0x12   : > { %650 = vmatprep.subr.bf16.mxu0 (!%p222_p10), %v815_v3  ;;  %655 = vmatpush3.bf16.msra.mxu1 (!%p222_p10), %v654_v9  ;;  %v660_v17 = vpack.c.bf16 (!%p222_p10), %v363_v15, %v362_v14  ;;  %v663_v20 = vpack.c.bf16 (!%p222_p10), %v365_v19, %v364_v18  ;;  %v366_v21 = vld [vmem:[%s1032_s3 + $0x40] sm:$0xff] (!%p222_p10)  ;;  %v367_v22 = vld [vmem:[%s1032_s3 + $0x48] sm:$0xff] (!%p222_p10)  ;;  %v368_v24 = vld [vmem:[%s1032_s3 + $0x50] sm:$0xff] (!%p222_p10) }
  0x13   : > { %656 = vmatprep.subr.bf16.mxu1 (!%p222_p10), %v815_v3  ;;  %v666_v23 = vpack.c.bf16 (!%p222_p10), %v367_v22, %v366_v21  ;;  %v369_v25 = vld [vmem:[%s1032_s3 + $0x58] sm:$0xff] (!%p222_p10)  ;;  %v370_v27 = vld [vmem:[%s1032_s3 + $0x60] sm:$0xff] (!%p222_p10)  ;;  %v371_v28 = vld [vmem:[%s1032_s3 + $0x68] sm:$0xff] (!%p222_p10) }
  0x14   : > { %v669_v26 = vpack.c.bf16 (!%p222_p10), %v369_v25, %v368_v24  ;;  %v672_v29 = vpack.c.bf16 (!%p222_p10), %v371_v28, %v370_v27  ;;  %v372_v30 = vld [vmem:[%s1032_s3 + $0x70] sm:$0xff] (!%p222_p10)  ;;  %v373_v31 = vld [vmem:[%s1032_s3 + $0x78] sm:$0xff] (!%p222_p10)  ;;  %v572_v33 = vld [vmem:[%s1031_s2] ss:$0 sm:$0xff] (!%p222_p10) }
  0x15   : > { %652 = vmatpush3.bf16.msra.mxu0 (!%p222_p10), %v651_v12  ;;  %v675_v32 = vpack.c.bf16 (!%p222_p10), %v373_v31, %v372_v30  ;;  %v574_v38 = vld [vmem:[%s1033_s4] ss:$0 sm:$0xff] (!%p222_p10) }
  0x16   : > { %s258_s8 = scalar_select %p257_p11, %s805_s21, 1  ;;  %658 = vmatpush3.bf16.msra.mxu1 %v657_v13 }
  0x17   : > { %659 = vmatprep.subr.bf16.mxu1 %v815_v3  ;;  %s818_s21 = smov [#allocation2]  }
  0x18   : > { %s571_s9 = sshll.u32 %s258_s8, 3  ;;  %s739_s29 = sshll.u32 %s818_s21, 4  ;;  %s740_s29 = int_to_ptr.vmem [resolvable:$false] %s739_s29 }
  0x19   : > { %s260_s16 = scalar_lea.vmem %s1029_s0, %s571_s9  ;;  %s254_s9 = sand.u32 1, %s797_s19  }
  0x1a   : > { %v271_v16 = vld [vmem:[%s260_s16] sm:$0xff]  ;;  %661 = vmatpush3.bf16.msra.mxu1 %v660_v17  ;;  %s570_s10 = sshll.u32 %s254_s9, 3  ;;  %s453_s25 = scalar_lea.sflag [#allocation3], %s254_s9 }
  0x1b   : > { %610 = vmatmul.mubr.msk.f32.vlgmr.msra.gmra.mrb[0].mxu0 %vm283_vm1, %v271_v16  ;;  %662 = vmatprep.subr.bf16.mxu1 %v815_v3  ;;  %s256_s14 = scalar_lea.vmem [#allocation2], %s570_s10  ;;  %s741_s7 = scalar_lea.vmem %s740_s29, 256 }
  0x1c   : > { %s466_s15 = sshll.u32 %s256_s14, 4  ;;  %s983_s15 = int_to_ptr.vmem [resolvable:$true] %s466_s15 }
  0x1d   : > { %s735_s27 = scalar_lea.vmem %s983_s15, 128  ;;  %p742_p1 = scmp.lt.s32.totalorder %s983_s15, %s740_s29 }
  0x1e   : > { %664 = vmatpush3.bf16.msra.mxu1 %v663_v20  ;;  %p736_p12 = scmp.ne.s32.totalorder %s983_s15, %s735_s27  ;;  %p743_p2 = scmp.lt.s32.totalorder %s741_s7, %s735_s27 }
  0x1f   : > { %665 = vmatprep.subr.bf16.mxu1 %v815_v3 }
  0x20   : > { %p737_p13 = pnand %p736_p12, %p889_p4  ;;  %p744_p3 = por %p743_p2, %p742_p1 }
  0x22   : > { %667 = vmatpush3.bf16.msra.mxu1 %v666_v23  ;;  %p738_p0 = pneg %p737_p13 }
  0x23   : > { %668 = vmatprep.subr.bf16.mxu1 %v815_v3 }
  0x24   : > { %p745_p5 = pnand %p744_p3, %p738_p0 }
  0x26   : > { %670 = vmatpush3.bf16.msra.mxu1 %v669_v26 }
  0x27   : > { %671 = vmatprep.subr.bf16.mxu1 %v815_v3 }
  0x2a   : > { %673 = vmatpush3.bf16.msra.mxu1 %v672_v29 }
  0x2b   : > { %674 = vmatprep.subr.bf16.mxu1 %v815_v3 }
  0x2e   : > { %676 = vmatpush3.bf16.msra.mxu1 %v675_v32 }
  0xee   : > { %v353_v34 = vpop.f32.mrb[0].mxu0 }
  0xef   : > { %v354_v35 = vadd.f32 %v572_v33, %v353_v34  ;;  %v611_v36 = vpop.f32.mrb[1].mxu0 }
  0xf1   : > { %v357_v37 = vmax.f32 %v354_v35, 0.0 }
  0xf3   : > { %645 = vmatmul.mubr.f32.vlgmr.msra.gmra.mrb[0].mxu1 %v357_v37 }
 0x1c6   : > { %v447_v39 = vpop.f32.mrb[0].mxu1 }
 0x1c7   : > { %v448_v40 = vadd.f32 %v574_v38, %v447_v39  ;;  %v646_v41 = vpop.f32.mrb[1].mxu1 }
 0x1c9   : > { %451 = vst.msk [vmem:[%s256_s14] sm:$0xff] %vm283_vm1, %v448_v40 }
 0x1ca   : > { %748 = shalt.err (!%p745_p5)
}
 0x1cb   : > { %s749_s8 = scalar_lea.hbm %s981_s24, 128  ;;  %s753_s11 = scalar_lea.hbm %s1034_s5, 256 }
 0x1cc   : > { %p750_p6 = scmp.ne.s32.totalorder %s981_s24, %s749_s8  ;;  %p754_p10 = scmp.lt.u32.totalorder %s981_s24, %s1034_s5 }
 0x1cd   : > { %p755_p11 = scmp.lt.u32.totalorder %s753_s11, %s749_s8  ;;  %p757_p13 = scmp.lt.u32.totalorder %s749_s8, %s981_s24 }
 0x1ce   : > { %p751_p7 = pnand %p750_p6, %p889_p4 }
 0x1cf   : > { %p756_p12 = por %p755_p11, %p754_p10 }
 0x1d0   : > { %p752_p9 = pneg %p751_p7 }
 0x1d1   : > { %p758_p0 = por %p757_p13, %p756_p12 }
 0x1d3   : > { %p759_p1 = pnand %p758_p0, %p752_p9 }
 0x1d5   : > { %762 = shalt.err (!%p759_p1)
}
 0x1d6   : > { %677 = dma.vmem_to_hbm [thread:$0]  (%p889_p4), %s983_s15, 128, %s981_s24, %s453_s25  }
 0x1d7 PF: > { %p683_p2 = scmp.ge.s32.totalorder %s813_s23, 2  ;;  %s478_s14 = sand.u32 1, %s793_s18  }
 0x1d8   : > { %s479_s16 = scalar_lea.sflag [#allocation3], %s478_s14 }
 0x1d9   : > { %p680_p3 = pnand %p683_p2, %p896_p8 }
 0x1db   : > { %788 = dma.done.wait (!%p680_p3), %s479_s16, 128  }
 0x1dc   : > { %790 = vsyncadd (!%p680_p3), %s479_s16, 4294967168  ;;  %s18_s23 = sadd.s32 1, %s813_s23   ;;  %s1037_s18 = smov %s797_s19 }
 0x1dd   : > { %p15_p5 = scmp.ge.s32.totalorder %s18_s23, 4   ;;  %s1038_s19 = smov %s801_s20 }
 0x1de   : > { %s1039_s20 = smov %s902_s6  ;;  %s1040_s21 = smov %s809_s22 }
 0x1df   : > { %s1041_s22 = smov %s1043_s26  ;;  %17 = sbr.rel (!%p15_p5) target bundleno = 4 (0x4), region = 81 }
 0x1e6   :  { %484 = vsyncpa [#allocation3], 1 }
 0x1e7   :  { %486 = vsyncpa [#allocation3 + $0x1], 1 }

</bundles_post_ra>
